<compile_context>
chip_gen: v7x
topology: tpu7x:2x2x1
jax: 0.10.0
libtpu: 0.0.40
codegen_flags: <defaults>
</compile_context>

<pallas_src>
import math

import jax
import jax.numpy as jnp
from jax.experimental import pallas as pl
from jax.experimental.pallas import tpu as pltpu


_TARGET_TILE_BYTES = 2 * 1024 * 1024  # per VMEM buffer (x4 with double-buffered in+out)


def _round_up(x: int, m: int) -> int:
    return -(-x // m) * m


def _choose_tiles(T: int, F: int, itemsize: int):
    """Pick (tT, fC): time-chunk and feature-chunk sizes for ~2 MiB tiles."""
    # Feature (lane) chunk: keep full F unless even 8 rows would blow the budget.
    if _round_up(F, 128) * itemsize * 8 <= _TARGET_TILE_BYTES:
        fC = F
    else:
        fC = max(128, (_TARGET_TILE_BYTES // (8 * itemsize)) // 128 * 128)
    row_bytes = _round_up(fC, 128) * itemsize
    tT = max(1, _TARGET_TILE_BYTES // row_bytes)
    if tT >= T:
        tT = T                       # full axis: no alignment requirement
    else:
        tT = max(8, (tT // 8) * 8)   # partial axis: keep a multiple of 8 sublanes
        tT = min(tT, T)
    return tT, fC


def _copy_tile_kernel(x_ref, o_ref):
    # Pure data movement: the (0,1) axis swap is expressed entirely by the
    # input/output BlockSpec index_maps, so the body is a straight VMEM copy.
    o_ref[...] = x_ref[...]


def dvs_encoder_forward(x: jax.Array) -> jax.Array:
    """Pallas implementation of DVSEncoder.forward: swap axes 0 and 1."""
    assert x.ndim >= 2, "transpose(0, 1) needs at least 2 dims"
    T, B = x.shape[0], x.shape[1]
    rest = x.shape[2:]
    F = math.prod(rest) if rest else 1

    if x.size == 0:
        # Degenerate empty tensor: nothing to copy.
        return jnp.swapaxes(x, 0, 1)

    # Lane-dense view: (T, B, 1, F). The explicit size-1 axis keeps every
    # block's last two dims equal to the array's last two dims (satisfies the
    # (8,128) block constraint for any B/T, including the ndim==2 case where
    # F == 1), while the trailing F dim carries all the lane-dense data.
    x4 = x.reshape(T, B, 1, F)

    tT, fC = _choose_tiles(T, F, x.dtype.itemsize)
    nT = pl.cdiv(T, tT)
    nF = pl.cdiv(F, fC)

    out4 = pl.pallas_call(
        _copy_tile_kernel,
        out_shape=jax.ShapeDtypeStruct((B, T, 1, F), x.dtype),
        grid_spec=pltpu.PrefetchScalarGridSpec(
            num_scalar_prefetch=0,
            # b outermost, T/F chunks innermost -> output writeback walks
            # contiguous HBM addresses for each batch row.
            grid=(B, nT, nF),
            in_specs=[
                pl.BlockSpec(
                    (tT, None, None, fC),            # kernel sees (tT, fC)
                    lambda b, i, f: (i, b, 0, f),
                ),
            ],
            out_specs=pl.BlockSpec(
                (None, tT, None, fC),                # kernel sees (tT, fC)
                lambda b, i, f: (b, i, 0, f),
            ),
        ),
        compiler_params=pltpu.CompilerParams(
            dimension_semantics=("parallel", "parallel", "parallel"),
            vmem_limit_bytes=32 * 1024 * 1024,
        ),
    )(x4)

    return out4.reshape((B, T) + rest)


if __name__ == "__main__":
    key = jax.random.PRNGKey(0)

    # Primary DVS-like input: (T=2, B=4, H=16, W=16) -> lane-dense F = 256.
    x = jax.random.normal(key, (2, 4, 16, 16), dtype=jnp.float32)
    y = jax.block_until_ready(dvs_encoder_forward(x))
    ref = jnp.swapaxes(x, 0, 1)
    assert y.shape == ref.shape and y.dtype == ref.dtype
    assert bool(jnp.array_equal(y, ref))

    # Small edge-case shapes: 2-D (previously a correctness concern) and 3-D.
    for shape, dtype in [((7, 3), jnp.float32), ((5, 3, 24), jnp.bfloat16)]:
        xi = jax.random.normal(jax.random.PRNGKey(1), shape, dtype=dtype)
        yi = jax.block_until_ready(dvs_encoder_forward(xi))
        refi = jnp.swapaxes(xi, 0, 1)
        assert yi.shape == refi.shape and yi.dtype == refi.dtype
        assert bool(jnp.array_equal(yi, refi))

    print("KERNEL_OK")
</pallas_src>

<mosaic_0001>
module attributes {stable_mosaic.version = 11 : i64} {
  func.func @_copy_tile_kernel(%arg0: i32, %arg1: i32, %arg2: i32, %arg3: memref<2x1x1x256xf32, #tpu.memory_space<vmem>>, %arg4: memref<1x2x1x256xf32, #tpu.memory_space<vmem>>) attributes {dimension_semantics = [#tpu.dimension_semantics<parallel>, #tpu.dimension_semantics<parallel>, #tpu.dimension_semantics<parallel>], iteration_bounds = array<i64: 4, 1, 1>, scalar_prefetch = 0 : i64, scratch_operands = 0 : i64, tpu.core_type = #tpu.core_type<tc>, window_params = [{transform_indices = @transform_0, window_bounds = array<i64: 2, 1, 1, 256>}, {transform_indices = @transform_1, window_bounds = array<i64: 1, 2, 1, 256>}]} {
    %c0 = arith.constant 0 : index
    %c0_0 = arith.constant 0 : index
    %c0_1 = arith.constant 0 : index
    %c0_2 = arith.constant 0 : index
    %0 = vector.load %arg3[%c0, %c0_0, %c0_1, %c0_2] : memref<2x1x1x256xf32, #tpu.memory_space<vmem>>, vector<2x1x1x256xf32>
    %1 = vector.shape_cast %0 : vector<2x1x1x256xf32> to vector<2x256xf32>
    %c0_3 = arith.constant 0 : index
    %c0_4 = arith.constant 0 : index
    %c0_5 = arith.constant 0 : index
    %c0_6 = arith.constant 0 : index
    %2 = vector.load %arg4[%c0_3, %c0_4, %c0_5, %c0_6] : memref<1x2x1x256xf32, #tpu.memory_space<vmem>>, vector<1x2x1x256xf32>
    %3 = vector.shape_cast %2 : vector<1x2x1x256xf32> to vector<2x256xf32>
    %4 = vector.shape_cast %1 : vector<2x256xf32> to vector<1x2x1x256xf32>
    tpu.vector_store %arg4[%c0_3, %c0_4, %c0_5, %c0_6], %4 {strides = array<i32>} : memref<1x2x1x256xf32, #tpu.memory_space<vmem>>, vector<1x2x1x256xf32>,
    return
  }
  func.func @transform_0(%arg0: i32, %arg1: i32, %arg2: i32) -> (i32, i32, i32, i32) {
    %c0_i32 = arith.constant 0 : i32
    %c0_i32_0 = arith.constant 0 : i32
    return %arg1, %arg0, %c0_i32, %arg2 : i32, i32, i32, i32
  }
  func.func @transform_1(%arg0: i32, %arg1: i32, %arg2: i32) -> (i32, i32, i32, i32) {
    %c0_i32 = arith.constant 0 : i32
    %c0_i32_0 = arith.constant 0 : i32
    return %arg0, %arg1, %c0_i32, %arg2 : i32, i32, i32, i32
  }
}

</mosaic_0001>

<bundles_post_ra>
// kernel: tpu_custom_call.1
= control target key start
LH: loop header
LB: loop body
LE: loop exit
PB: predicated region body
PF: predicated region fallthrough
CT: control target
= control target key end

     0   :  { %6 = vsyncpa [#allocation3], 0  ;;  %s678_s0 = inlined_call_operand.hbm [shape: f32[2,4,1,256], index: 0, kind: input, shape index: {}]   ;;  %s679_s1 = inlined_call_operand.hbm [shape: f32[4,2,1,256], index: 1, kind: output, shape index: {}]  }
   0x1   :  { %8 = vsyncpa [#allocation3 + $0x1], 0 }
   0x2   :  { %9 = vsyncpa [#allocation4], 0 }
   0x3   :  { %11 = vsyncpa [#allocation4 + $0x1], 0  ;;  %s507_s6 = smov 0   ;;  %s509_s7 = smov 0  }
   0x4   :  { %s511_s8 = smov 0   ;;  %s513_s9 = smov 0  }
   0x5   :  { %s515_s10 = smov 0   ;;  %s517_s11 = smov 0  }
   0x6 LB: > { %s292_s12 = sadd.s32 4294967295, %s488_s11   ;;  %s293_s13 = sadd.s32 4294967294, %s488_s11   ;;  %s488_s11 = sphi %s517_s11, %s17_s11   ;;  %s484_s10 = sphi %s515_s10, %s692_s10   ;;  %s480_s9 = sphi %s513_s9, %s691_s9   ;;  %s476_s8 = sphi %s511_s8, %s690_s8   ;;  %s472_s7 = sphi %s509_s7, %s689_s7   ;;  %s468_s6 = sphi %s507_s6, %s688_s6  }
   0x7   : > { %s36_s14 = sadd.s32 1, %s484_s10  ;;  %s47_s15 = sadd.s32 1, %s476_s8 }
   0x8   : > { %p38_p0 = scmp.ge.s32.totalorder %s36_s14, 4  ;;  %p54_p1 = scmp.ne.s32.totalorder %s476_s8, %s472_s7 }
   0x9   : > { %p55_p2 = scmp.eq.s32.totalorder %s488_s11, 0  ;;  %p60_p3 = scmp.ne.s32.totalorder %s472_s7, %s468_s6 }
   0xa   : > { %s694_s14 = smov (%p38_p0, %s36_s14), 0  ;;  %p61_p5 = scmp.eq.s32.totalorder %s292_s12, 0 }
   0xb   : > { %p548_p4 = por %p55_p2, %p54_p1  ;;  %s41_s17 = ssub.s32 %s484_s10, %s694_s14 }
   0xc   : > { %p88_p6 = scmp.eq.s32.totalorder %s292_s12, 3  ;;  %p45_p7 = scmp.eq.s32.totalorder %s41_s17, 0 }
   0xd   : > { %p554_p8 = por %p61_p5, %p60_p3  ;;  %p94_p10 = scmp.eq.s32.totalorder %s293_s13, 3 }
   0xe   : > { %p558_p9 = por %p88_p6, %p54_p1  ;;  %p321_p12 = scmp.lt.s32.totalorder %s488_s11, 4 }
   0xf   : > { %s563_s20 = scalar_select %p45_p7, %s476_s8, %s47_s15  }
  0x10   : > { %s683_s19 = scalar_select %p558_p9, 1, 0 }
  0x11   : > { %p565_p11 = por %p94_p10, %p60_p3  ;;  %s114_s22 = sand.u32 1, %s476_s8  }
  0x12   : > { %s296_s23 = sshll.u32 %s114_s22, 2  ;;  %s307_s24 = sshll.u32 %s484_s10, 5 }
  0x13   : > { %s684_s21 = scalar_select %p565_p11, 1, 0 }
  0x14   : > { %s575_s27 = scalar_lea.hbm %s678_s0, %s307_s24  ;;  %s118_s28 = scalar_lea.vmem [#allocation2], %s296_s23 }
  0x15   : > { %s130_s29 = sshll.u32 %s118_s28, 4  ;;  %p581_p13 = pnand %p321_p12, %p548_p4  ;;  %s577_s29 = int_to_ptr.vmem [resolvable:$true] %s130_s29 }
  0x16   : > { %s585_s2 = scalar_lea.sflag [#allocation3], %s114_s22  ;;  %s376_s3 = scalar_lea.hbm %s575_s27, 64 }
  0x17   : > { %p377_p0 = scmp.ne.s32.totalorder %s575_s27, %s376_s3  ;;  %p378_p1 = pneg %p581_p13 }
  0x18   : > { %s381_s12 = scalar_lea.hbm %s678_s0, 256  ;;  %p382_p4 = scmp.lt.u32.totalorder %s575_s27, %s678_s0 }
  0x19   : > { %p379_p2 = pnand %p378_p1, %p377_p0  ;;  %p383_p5 = scmp.lt.u32.totalorder %s381_s12, %s376_s3 }
  0x1a   : > { %p385_p7 = scmp.lt.u32.totalorder %s376_s3, %s575_s27 }
  0x1b   : > { %p380_p3 = pneg %p379_p2  ;;  %p384_p6 = por %p383_p5, %p382_p4 }
  0x1d   : > { %p386_p10 = por %p385_p7, %p384_p6 }
  0x1f   : > { %p387_p12 = pnand %p386_p10, %p380_p3 }
  0x21   : > { %390 = shalt.err (!%p387_p12)
}
  0x22   : > { %s391_s16 = scalar_lea.vmem %s577_s29, 64  ;;  %s490_s17 = smov [#allocation2]  }
  0x23   : > { %p392_p0 = scmp.ne.s32.totalorder %s577_s29, %s391_s16  ;;  %s396_s22 = sshll.u32 %s490_s17, 4  ;;  %s397_s22 = int_to_ptr.vmem [resolvable:$false] %s396_s22 }
  0x24   : > { %s398_s23 = scalar_lea.vmem %s397_s22, 128  ;;  %p399_p9 = scmp.lt.s32.totalorder %s577_s29, %s397_s22 }
  0x25   : > { %p394_p2 = pnand %p392_p0, %p378_p1  ;;  %p400_p4 = scmp.lt.s32.totalorder %s398_s23, %s391_s16 }
  0x27   : > { %p395_p11 = pneg %p394_p2  ;;  %p401_p5 = por %p400_p4, %p399_p9 }
  0x29   : > { %p402_p6 = pnand %p401_p5, %p395_p11 }
  0x2b   : > { %405 = shalt.err (!%p402_p6)
}
  0x2c   : > { %s491_s24 = smov 128   ;;  %s492_s25 = smov 32  }
  0x2d   : > { %s493_s26 = smov 2   ;;  %p299_p1 = scmp.ge.s32.totalorder %s488_s11, 1 }
  0x2e   : > { %316 = dma.hbm_to_vmem [thread:$0]  (!%p581_p13), %s575_s27, 64, %s577_s29, %s585_s2, %s491_s24, %s492_s25, %s493_s26  }
  0x2f   : > { %p138_p3 = scmp.lt.s32.totalorder %s488_s11, 5 }
  0x31   : > { %p139_p7 = pnand %p299_p1, %p138_p3 }
  0x32   : > { %s616_s28 = sand.u32 (!%p139_p7), 1, %s472_s7  }
  0x33   : > { %142 = sbr.rel (%p139_p7) target bundleno = 86 (0x56), region = 24  ;;  %s300_s3 = sshll.u32 (!%p139_p7), %s616_s28, 2 }
  0x34   : > { %s145_s4 = scalar_lea.sflag (!%p139_p7), [#allocation3], %s616_s28  ;;  %s148_s5 = scalar_lea.vmem (!%p139_p7), [#allocation2], %s300_s3 }
  0x3a   : > { %459 = dma.done.wait (%p554_p8), %s145_s4, 64  }
  0x3b   : > { %461 = vsyncadd (%p554_p8), %s145_s4, 4294967232  ;;  %v173_v0 = vlaneseq  ;;  %s166_s27 = scalar_lea.vmem [#allocation5], %s300_s3  ;;  %s308_s30 = sshll.u32 %s480_s9, 6  ;;  %v171_v1 = vld [vmem:[%s148_s5] sm:$0x3] }
  0x3c   : > { %s198_s29 = sshll.u32 %s166_s27, 4  ;;  %s630_s13 = scalar_lea.hbm %s679_s1, %s308_s30  ;;  %v172_v2 = vld [vmem:[%s148_s5 + $0x2] sm:$0x3]  ;;  %s625_s29 = int_to_ptr.vmem [resolvable:$true] %s198_s29 }
  0x3d   : > { %vm175_vm0 = vcmp.lt.s32.totalorder %v173_v0, 256  ;;  %s180_s18 = scalar_lea.sflag [#allocation4], %s616_s28  ;;  %s406_s15 = scalar_lea.vmem %s625_s29, 64 }
  0x3e   : > { %177 = vst.msk [vmem:[%s166_s27] sm:$0x3] %vm175_vm0, %v171_v1  ;;  %178 = vst.msk [vmem:[%s166_s27 + $0x2] sm:$0x3] %vm175_vm0, %v172_v2  ;;  %p407_p8 = scmp.ne.s32.totalorder %s625_s29, %s406_s15  ;;  %p686_p9 = scmp.ne.s32.totalorder %s683_s19, 0 }
  0x3f   : > { %s494_s9 = smov [#allocation5]  }
  0x40   : > { %p408_p11 = pnand %p407_p8, %p686_p9  ;;  %s410_s16 = sshll.u32 %s494_s9, 4  ;;  %s411_s16 = int_to_ptr.vmem [resolvable:$false] %s410_s16 }
  0x41   : > { %s412_s17 = scalar_lea.vmem %s411_s16, 128  ;;  %p413_p10 = scmp.lt.s32.totalorder %s625_s29, %s411_s16 }
  0x42   : > { %p409_p13 = pneg %p408_p11  ;;  %p414_p12 = scmp.lt.s32.totalorder %s412_s17, %s406_s15 }
  0x44   : > { %p415_p0 = por %p414_p12, %p413_p10 }
  0x46   : > { %p416_p2 = pnand %p415_p0, %p409_p13 }
  0x48   : > { %419 = shalt.err (!%p416_p2)
}
  0x49   : > { %s420_s22 = scalar_lea.hbm %s630_s13, 64  ;;  %s424_s25 = scalar_lea.hbm %s679_s1, 256 }
  0x4a   : > { %p421_p4 = scmp.ne.s32.totalorder %s630_s13, %s420_s22  ;;  %p425_p1 = scmp.lt.u32.totalorder %s630_s13, %s679_s1 }
  0x4b   : > { %p426_p3 = scmp.lt.u32.totalorder %s424_s25, %s420_s22  ;;  %p428_p8 = scmp.lt.u32.totalorder %s420_s22, %s630_s13 }
  0x4c   : > { %p422_p5 = pnand %p421_p4, %p686_p9 }
  0x4d   : > { %p427_p7 = por %p426_p3, %p425_p1 }
  0x4e   : > { %p423_p6 = pneg %p422_p5 }
  0x4f   : > { %p429_p11 = por %p428_p8, %p427_p7 }
  0x51   : > { %p430_p13 = pnand %p429_p11, %p423_p6 }
  0x53   : > { %433 = shalt.err (!%p430_p13)
}
  0x54   : > { %s495_s4 = smov 32   ;;  %s496_s5 = smov 2  }
  0x55   : > { %311 = dma.vmem_to_hbm [thread:$0]  (%p686_p9), %s625_s29, 64, %s630_s13, %s180_s18, %s495_s4, %s495_s4, %s496_s5  }
  0x56 PF: > { %p322_p10 = scmp.ge.s32.totalorder %s488_s11, 2  ;;  %s213_s27 = sand.u32 1, %s468_s6  }
  0x57   : > { %p687_p12 = scmp.ne.s32.totalorder %s684_s21, 0  ;;  %s214_s30 = scalar_lea.sflag [#allocation4], %s213_s27 }
  0x59   : > { %p318_p0 = pnand %p322_p10, %p687_p12 }
  0x5b   : > { %463 = dma.done.wait (!%p318_p0), %s214_s30, 64  }
  0x5c   : > { %465 = vsyncadd (!%p318_p0), %s214_s30, 4294967232  ;;  %s17_s11 = sadd.s32 1, %s488_s11   ;;  %s688_s6 = smov %s472_s7 }
  0x5d   : > { %p14_p2 = scmp.ge.s32.totalorder %s17_s11, 6   ;;  %s689_s7 = smov %s476_s8 }
  0x5e   : > { %s690_s8 = smov %s563_s20  ;;  %s691_s9 = smov %s484_s10 }
  0x5f   : > { %s692_s10 = smov %s694_s14  ;;  %16 = sbr.rel (!%p14_p2) target bundleno = 6 (0x6), region = 69 }
  0x66   :  { %219 = vsyncpa [#allocation3], 1 }
  0x67   :  { %221 = vsyncpa [#allocation3 + $0x1], 1 }
  0x68   :  { %222 = vsyncpa [#allocation4], 1 }
  0x69   :  { %224 = vsyncpa [#allocation4 + $0x1], 1 }

</bundles_post_ra>
